<compile_context>
chip_gen: v5e
topology: v5e:2x2
jax: 0.10.0
libtpu: 0.0.40
codegen_flags: <defaults>
</compile_context>

<pallas_src>
import math
import functools

import jax
import jax.numpy as jnp
from jax.experimental import pallas as pl
from jax.experimental.pallas import tpu as pltpu


def _scaled_posenc_kernel(alpha_ref, x_ref, pe_ref, o_ref):
    # alpha_ref: (1,) f32 in SMEM
    # x_ref / o_ref: (1, time_tile, D) VMEM tiles
    # pe_ref: (time_tile, D) VMEM tile (resident across the inner batch axis)
    alpha = alpha_ref[0]
    x = x_ref[...].astype(jnp.float32)
    pe = pe_ref[...].astype(jnp.float32)
    o_ref[...] = (x + alpha * pe[None, :, :]).astype(o_ref.dtype)


def _make_pe_table(T, D, dtype):
    """Sinusoidal positional-encoding table, identical to extend_pe()."""
    position = jnp.arange(T, dtype=jnp.float32)[:, None]
    div_term = jnp.exp(
        jnp.arange(0, D, 2, dtype=jnp.float32) * (-math.log(10000.0) / D))
    pe = jnp.zeros((T, D), jnp.float32)
    pe = pe.at[:, 0::2].set(jnp.sin(position * div_term))
    pe = pe.at[:, 1::2].set(jnp.cos(position * div_term))
    # PyTorch module keeps pe in the input dtype (extend_pe: pe.to(dtype=x.dtype))
    return pe.astype(dtype)


def _pick_time_tile(T, D, itemsize, target_bytes=2 << 20):
    """Largest tile that divides T, is a multiple of 8 (or == T), and keeps
    each buffer at roughly <= target_bytes."""
    if T % 8 != 0:
        return T  # full-axis block is always legal
    max_rows = max(8, target_bytes // max(1, D * itemsize))
    cands = [t for t in range(8, T + 1, 8) if T % t == 0 and t <= max_rows]
    return max(cands) if cands else T


def scaled_positional_encoding(x, alpha, d_model, dropout_rate=0.0,
                               max_len=5000, time_tile=None):
    """espnet ScaledPositionalEncoding forward (eval mode).

    x: (batch, time, d_model);  alpha: python float or 0-d/1-elem array.
    """
    B, T, D = x.shape
    assert D == d_model
    assert T <= max_len
    assert D % 2 == 0, "sinusoidal PE requires even d_model"
    # TODO(synk): dropout_rate accepted for API parity but not applied (eval mode).

    pe = _make_pe_table(T, D, x.dtype)
    alpha_arr = jnp.asarray(alpha, dtype=jnp.float32).reshape((1,))

    if time_tile is None:
        time_tile = _pick_time_tile(T, D, jnp.dtype(x.dtype).itemsize)
    assert T % time_tile == 0
    assert time_tile == T or time_tile % 8 == 0

    n_t = T // time_tile

    # Generous VMEM budget: in/out double-buffered + pe + f32 temps + slack.
    tile_bytes_f32 = time_tile * D * 4
    vmem_limit = min(64 * 1024 * 1024,
                     max(16 * 1024 * 1024, 8 * tile_bytes_f32 + 4 * 1024 * 1024))

    return pl.pallas_call(
        _scaled_posenc_kernel,
        out_shape=jax.ShapeDtypeStruct((B, T, D), x.dtype),
        grid_spec=pltpu.PrefetchScalarGridSpec(
            num_scalar_prefetch=0,
            grid=(n_t, B),
            in_specs=[
                # alpha: whole (1,) array in SMEM, no blocking
                pl.BlockSpec(memory_space=pltpu.MemorySpace.SMEM),
                # x: one batch row, one time tile
                pl.BlockSpec((1, time_tile, D), lambda t, b: (b, t, 0)),
                # pe: depends only on the time tile -> stays resident across b
                pl.BlockSpec((time_tile, D), lambda t, b: (t, 0)),
            ],
            out_specs=pl.BlockSpec((1, time_tile, D), lambda t, b: (b, t, 0)),
        ),
        compiler_params=pltpu.CompilerParams(
            dimension_semantics=("parallel", "arbitrary"),
            vmem_limit_bytes=vmem_limit),
    )(alpha_arr, x, pe)


def _reference(x, alpha):
    """Pure-JAX reference mirroring ScaledPositionalEncoding (eval mode)."""
    B, T, D = x.shape
    pe = _make_pe_table(T, D, jnp.float32)
    return (x.astype(jnp.float32)
            + jnp.float32(alpha) * pe[None, :, :]).astype(x.dtype)


if __name__ == "__main__":
    key = jax.random.PRNGKey(0)
    B, T, D = 2, 8, 32  # batch, time, d_model
    x = jax.random.normal(key, (B, T, D), dtype=jnp.float32)
    alpha = 0.75  # learnable scalar in the PyTorch module

    out = scaled_positional_encoding(x, alpha, d_model=D, dropout_rate=0.1)
    out = jax.block_until_ready(out)

    ref = _reference(x, alpha)
    assert out.shape == (B, T, D)
    assert jnp.allclose(out, ref, atol=1e-5, rtol=1e-5), \
        f"max err {jnp.max(jnp.abs(out - ref))}"
    print("KERNEL_OK")
</pallas_src>

<mosaic_0001>
module attributes {stable_mosaic.version = 11 : i64} {
  func.func @_scaled_posenc_kernel(%arg0: i32, %arg1: i32, %arg2: memref<1xf32, #tpu.memory_space<smem>>, %arg3: memref<1x8x32xf32, #tpu.memory_space<vmem>>, %arg4: memref<8x32xf32, #tpu.memory_space<vmem>>, %arg5: memref<1x8x32xf32, #tpu.memory_space<vmem>>) attributes {dimension_semantics = [#tpu.dimension_semantics<parallel>, #tpu.dimension_semantics<arbitrary>], iteration_bounds = array<i64: 1, 2>, scalar_prefetch = 0 : i64, scratch_operands = 0 : i64, tpu.core_type = #tpu.core_type<tc>, window_params = [{transform_indices = @transform_0, window_bounds = array<i64: 1>}, {transform_indices = @transform_1, window_bounds = array<i64: 1, 8, 32>}, {transform_indices = @transform_2, window_bounds = array<i64: 8, 32>}, {transform_indices = @transform_3, window_bounds = array<i64: 1, 8, 32>}]} {
    %c0 = arith.constant 0 : index
    %0 = memref.load %arg2[%c0] : memref<1xf32, #tpu.memory_space<smem>>
    %c0_0 = arith.constant 0 : index
    %c0_1 = arith.constant 0 : index
    %c0_2 = arith.constant 0 : index
    %1 = vector.load %arg3[%c0_0, %c0_1, %c0_2] : memref<1x8x32xf32, #tpu.memory_space<vmem>>, vector<1x8x32xf32>
    %c0_3 = arith.constant 0 : index
    %c0_4 = arith.constant 0 : index
    %2 = vector.load %arg4[%c0_3, %c0_4] : memref<8x32xf32, #tpu.memory_space<vmem>>, vector<8x32xf32>
    %3 = vector.shape_cast %2 : vector<8x32xf32> to vector<1x8x32xf32>
    %4 = vector.broadcast %0 : f32 to vector<1x8x32xf32>
    %5 = arith.mulf %4, %3 : vector<1x8x32xf32>
    %6 = arith.addf %1, %5 : vector<1x8x32xf32>
    %c0_5 = arith.constant 0 : index
    %c0_6 = arith.constant 0 : index
    %c0_7 = arith.constant 0 : index
    %7 = vector.load %arg5[%c0_5, %c0_6, %c0_7] : memref<1x8x32xf32, #tpu.memory_space<vmem>>, vector<1x8x32xf32>
    tpu.vector_store %arg5[%c0_5, %c0_6, %c0_7], %6 {strides = array<i32>} : memref<1x8x32xf32, #tpu.memory_space<vmem>>, vector<1x8x32xf32>,
    return
  }
  func.func @transform_0(%arg0: i32, %arg1: i32) -> i32 {
    %c0_i32 = arith.constant 0 : i32
    %c0_i32_0 = arith.constant 0 : i32
    return %c0_i32 : i32
  }
  func.func @transform_1(%arg0: i32, %arg1: i32) -> (i32, i32, i32) {
    %c0_i32 = arith.constant 0 : i32
    %c0_i32_0 = arith.constant 0 : i32
    return %arg1, %arg0, %c0_i32 : i32, i32, i32
  }
  func.func @transform_2(%arg0: i32, %arg1: i32) -> (i32, i32) {
    %c0_i32 = arith.constant 0 : i32
    %c0_i32_0 = arith.constant 0 : i32
    return %arg0, %c0_i32 : i32, i32
  }
  func.func @transform_3(%arg0: i32, %arg1: i32) -> (i32, i32, i32) {
    %c0_i32 = arith.constant 0 : i32
    %c0_i32_0 = arith.constant 0 : i32
    return %arg1, %arg0, %c0_i32 : i32, i32, i32
  }
}

</mosaic_0001>

<bundles_post_ra>
// kernel: tpu_custom_call.1
= control target key start
LH: loop header
LB: loop body
LE: loop exit
PB: predicated region body
PF: predicated region fallthrough
CT: control target
= control target key end

     0   :  { %s754_s0 = inlined_call_operand.<no memory space> [shape: f32[1], index: 0, kind: input, shape index: {}]   ;;  %s755_s1 = inlined_call_operand.hbm [shape: f32[2,8,32], index: 1, kind: input, shape index: {}]   ;;  %s756_s2 = inlined_call_operand.hbm [shape: f32[8,32], index: 2, kind: input, shape index: {}]   ;;  %s757_s3 = inlined_call_operand.hbm [shape: f32[2,8,32], index: 3, kind: output, shape index: {}]  }
   0x1   :  { %8 = sst [smem:[#allocation2]] %s754_s0 }
   0x2   :  { %9 = vsyncpa [#allocation4], 0 }
   0x3   :  { %11 = vsyncpa [#allocation4 + $0x1], 0 }
   0x4   :  { %12 = vsyncpa [#allocation7], 0 }
   0x5   :  { %13 = vsyncpa [#allocation5], 0 }
   0x6   :  { %15 = vsyncpa [#allocation5 + $0x1], 0  ;;  %s605_s14 = smov 0   ;;  %s607_s15 = smov 0  }
   0x7   :  { %s609_s16 = smov 0   ;;  %s611_s17 = smov 0  }
   0x8   :  { %s613_s18 = smov 0   ;;  %s615_s19 = smov 0  }
   0x9 LB: > { %s345_s0 = sadd.s32 4294967295, %s579_s19   ;;  %s346_s20 = sadd.s32 4294967294, %s579_s19   ;;  %s579_s19 = sphi %s615_s19, %s21_s19   ;;  %s575_s18 = sphi %s613_s18, %s769_s18   ;;  %s571_s17 = sphi %s611_s17, %s768_s17   ;;  %s567_s16 = sphi %s609_s16, %s767_s16   ;;  %s563_s15 = sphi %s607_s15, %s766_s15   ;;  %s559_s14 = sphi %s605_s14, %s765_s14  }
   0xa   : > { %p76_p0 = scmp.ne.s32.totalorder %s563_s15, %s559_s14  ;;  %p639_p1 = scmp.eq.s32.totalorder %s345_s0, 0 }
   0xb   : > { %p643_p2 = scmp.eq.s32.totalorder %s345_s0, 1  ;;  %p134_p3 = scmp.eq.s32.totalorder %s346_s20, 1 }
   0xc   : > { %p649_p4 = por %p639_p1, %p76_p0  ;;  %p347_p5 = scmp.ge.s32.totalorder %s579_s19, 1 }
   0xd   : > { %p654_p6 = por %p134_p3, %p76_p0  ;;  %p141_p7 = scmp.lt.s32.totalorder %s579_s19, 3 }
   0xe   : > { %s158_s27 = sshll.u32 %s756_s2, 4  ;;  %p349_p9 = scmp.ge.s32.totalorder %s579_s19, 2  ;;  %s159_s27 = int_to_ptr.hbm [resolvable:$true] %s158_s27 }
   0xf   : > { %p662_p8 = pnand %p347_p5, %p141_p7  ;;  %s581_s29 = smov [#allocation6]  }
  0x10   : > { %s160_s30 = sshll.u32 %s581_s29, 4  ;;  %s30_s4 = sadd.s32 1, %s575_s18  ;;  %s161_s30 = int_to_ptr.vmem [resolvable:$true] %s160_s30 }
  0x11   : > { %p368_p10 = pneg %p662_p8  ;;  %p31_p12 = scmp.ge.s32.totalorder %s30_s4, 2 }
  0x12   : > { %s63_s5 = sadd.s32 1, %s567_s16  ;;  %p70_p13 = scmp.ne.s32.totalorder %s567_s16, %s563_s15 }
  0x13   : > { %p369_p11 = pnand %p368_p10, %p639_p1  ;;  %p71_p0 = scmp.eq.s32.totalorder %s579_s19, 0 }
  0x14   : > { %s771_s4 = smov (%p31_p12, %s30_s4), 0  ;;  %p684_p5 = por %p643_p2, %p70_p13 }
  0x15   : > { %371 = dma.hbm_to_vmem [thread:$0]  (!%p369_p11), %s159_s27, 128, %s161_s30, [#allocation7]  }
  0x16   : > { %p678_p3 = por %p71_p0, %p70_p13  ;;  %s58_s8 = ssub.s32 %s575_s18, %s771_s4 }
  0x17   : > { %p381_p7 = scmp.lt.s32.totalorder %s579_s19, 2  ;;  %p61_p10 = scmp.eq.s32.totalorder %s58_s8, 0 }
  0x18   : > { %s171_s9 = sand.u32 1, %s567_s16   ;;  %s351_s12 = sshll.u32 %s575_s18, 3 }
  0x19   : > { %s350_s10 = sshll.u32 %s171_s9, 3  ;;  %s180_s20 = scalar_lea.hbm %s755_s1, %s351_s12 }
  0x1a   : > { %s693_s11 = scalar_select %p61_p10, %s567_s16, %s63_s5  }
  0x1b   : > { %s175_s25 = scalar_lea.vmem [#allocation3], %s350_s10  ;;  %s182_s22 = sshll.u32 %s180_s20, 4  ;;  %s183_s22 = int_to_ptr.hbm [resolvable:$true] %s182_s22 }
  0x1c   : > { %s184_s26 = sshll.u32 %s175_s25, 4  ;;  %p373_p2 = pnand %p381_p7, %p678_p3  ;;  %s185_s26 = int_to_ptr.vmem [resolvable:$true] %s184_s26 }
  0x1d   : > { %s172_s27 = scalar_lea.sflag [#allocation4], %s171_s9  ;;  %193 = sbr.rel (%p662_p8) target bundleno = 52 (0x34), region = 32 }
  0x1e   : > { %375 = dma.hbm_to_vmem [thread:$0]  (!%p373_p2), %s183_s22, 128, %s185_s26, %s172_s27  }
  0x1f   : > { %s704_s29 = sand.u32 (!%p662_p8), 1, %s563_s15  }
  0x20   : > { %s353_s30 = sshll.u32 (!%p662_p8), %s704_s29, 3  ;;  %s196_s5 = scalar_lea.sflag (!%p662_p8), [#allocation4], %s704_s29 }
  0x21   : > { %s199_s8 = scalar_lea.vmem (!%p662_p8), [#allocation3], %s353_s30 }
  0x22   : > { %546 = dma.done.wait (%p649_p4), %s196_s5, 128  }
  0x23   : > { %548 = vsyncadd (%p649_p4), %s196_s5, 4294967168 }
  0x24   : > { %550 = dma.done.wait (%p639_p1), [#allocation7], 128  }
  0x25   : > { %552 = vsyncadd (%p639_p1), [#allocation7], 4294967168  ;;  %s228_s28 = sld [smem:[#allocation2]]  ;;  %s357_s6 = sshll.u32 %s571_s17, 3  ;;  %v230_v0 = vld [vmem:[#allocation6] sm:$0xff]  ;;  %v229_v2 = vld [vmem:[%s199_s8] sm:$0xff] }
  0x26   : > { %s248_s12 = scalar_lea.hbm %s757_s3, %s357_s6  ;;  %s227_s23 = scalar_lea.vmem [#allocation8], %s353_s30  ;;  %vm234_vm0 = vcmask 261120  }
  0x27   : > { %s250_s13 = sshll.u32 %s227_s23, 4  ;;  %s252_s0 = sshll.u32 %s248_s12, 4  ;;  %s251_s13 = int_to_ptr.vmem [resolvable:$true] %s250_s13  ;;  %s253_s0 = int_to_ptr.hbm [resolvable:$true] %s252_s0 }
  0x28   : > { %s237_s21 = scalar_lea.sflag [#allocation5], %s704_s29  ;;  %s507_s20 = sshra.s32 %s253_s0, 4  ;;  %s508_s20 = int_to_ptr.hbm [resolvable:$true] %s507_s20 }
  0x29   : > { %s509_s17 = scalar_lea.hbm %s508_s20, 8  ;;  %s513_s22 = scalar_lea.hbm %s757_s3, 16 }
  0x2a   : > { %p510_p1 = scmp.ne.s32.totalorder %s508_s20, %s509_s17  ;;  %p514_p11 = scmp.lt.s32.totalorder %s508_s20, %s757_s3 }
  0x2b   : > { %v231_v1 = vstv %s228_s28  ;;  %p515_p12 = scmp.lt.s32.totalorder %s513_s22, %s509_s17 }
  0x2c   : > { %v232_v3 = vmul.f32 %v231_v1, %v230_v0  ;;  %p511_p4 = pnand %p510_p1, %p684_p5 }
  0x2d   : > { %p516_p13 = por %p515_p12, %p514_p11 }
  0x2e   : > { %v233_v4 = vadd.f32 %v232_v3, %v229_v2  ;;  %p512_p8 = pneg %p511_p4 }
  0x30   : > { %235 = vst.msk [vmem:[%s227_s23] sm:$0xff] %vm234_vm0, %v233_v4  ;;  %p517_p0 = pnand %p516_p13, %p512_p8 }
  0x32   : > { %520 = shalt.err (!%p517_p0)
}
  0x33   : > { %366 = dma.vmem_to_hbm [thread:$0]  (%p684_p5), %s251_s13, 128, %s253_s0, %s237_s21  }
  0x34 PF: > { %s264_s29 = sand.u32 1, %s559_s14   ;;  %p377_p3 = pnand %p349_p9, %p654_p6 }
  0x35   : > { %s265_s5 = scalar_lea.sflag [#allocation5], %s264_s29 }
  0x36   : > { %p378_p7 = pneg %p377_p3 }
  0x38   : > { %554 = dma.done.wait (%p378_p7), %s265_s5, 128  }
  0x39   : > { %556 = vsyncadd (%p378_p7), %s265_s5, 4294967168  ;;  %s21_s19 = sadd.s32 1, %s579_s19   ;;  %s765_s14 = smov %s563_s15 }
  0x3a   : > { %p18_p10 = scmp.ge.s32.totalorder %s21_s19, 4   ;;  %s766_s15 = smov %s567_s16 }
  0x3b   : > { %s767_s16 = smov %s693_s11  ;;  %s768_s17 = smov %s575_s18 }
  0x3c   : > { %s769_s18 = smov %s771_s4  ;;  %20 = sbr.rel (!%p18_p10) target bundleno = 9 (0x9), region = 82 }
  0x41   :  { %271 = vsyncpa [#allocation4], 1 }
  0x42   :  { %273 = vsyncpa [#allocation4 + $0x1], 1 }
  0x43   :  { %274 = vsyncpa [#allocation7], 1 }
  0x44   :  { %275 = vsyncpa [#allocation5], 1 }
  0x45   :  { %277 = vsyncpa [#allocation5 + $0x1], 1 }

</bundles_post_ra>
